<compile_context>
chip_gen: v7x
topology: tpu7x:2x2x1
jax: 0.10.0
libtpu: 0.0.40
codegen_flags: <defaults>
</compile_context>

<pallas_src>
import functools
import math

import jax
import jax.numpy as jnp
from jax import lax
from jax.experimental import pallas as pl
from jax.experimental.pallas import tpu as pltpu

_MiB = 1024 * 1024


def _tpu_config():
    """Generation-aware VMEM limit and block budgets.

    v5e / v6e: 128 MiB physical VMEM, 1 TensorCore  -> big tiles, no B//2 cap.
    v7x      :  64 MiB physical VMEM, 2 TensorCores -> bounded limits, keep
                >= 2 steps on the parallel batch axis so both TCs get work.
    """
    cap = 128 * _MiB
    try:
        info = pltpu.get_tpu_info()
        cap = int(getattr(info, "vmem_capacity_bytes", cap))
    except Exception:
        pass
    if cap >= 96 * _MiB:          # v5e / v6e class (128 MiB VMEM, single TC)
        return {
            "vmem_limit": 64 * _MiB,
            "apply_budget": 12 * _MiB,
            "stats_budget": 24 * _MiB,
            "fused_max_x_bytes": 8 * _MiB,
            "num_tc": 1,
        }
    # v7x class (64 MiB VMEM, 2 TensorCores) -- stay well below physical VMEM.
    return {
        "vmem_limit": 40 * _MiB,
        "apply_budget": 6 * _MiB,
        "stats_budget": 12 * _MiB,
        "fused_max_x_bytes": 5 * _MiB,
        "num_tc": 2,
    }


# --------------------------------------------------------------------------
# Kernels
# --------------------------------------------------------------------------

def _fused_train_3d_kernel(x_ref, lg_ref, bt_ref, y_ref, mean_ref, var_ref, *, eps):
    # x: (B, C, P) fully resident in VMEM.  Centered two-pass mean/var, then y.
    x = x_ref[...].astype(jnp.float32)
    n = x.shape[0] * x.shape[2]
    xs = jnp.sum(x, axis=0)                                   # (C, P)  pure VPU adds
    mean = jnp.sum(xs, axis=-1, keepdims=True) / n            # (C, 1)  one lane reduce
    d = x - mean[None, :, :]
    var = jnp.sum(jnp.sum(d * d, axis=0), axis=-1, keepdims=True) / n + eps
    scale = jnp.exp(lg_ref[...]) * lax.rsqrt(var)             # (C, 1)  EUP, ~free
    y_ref[...] = (d * scale[None, :, :] + bt_ref[...][None, :, :]).astype(y_ref.dtype)
    mean_ref[...] = mean
    var_ref[...] = var


def _fused_train_2d_kernel(x_ref, lg_ref, bt_ref, y_ref, mean_ref, var_ref, *, eps):
    # x: (B, C) with C on the lane axis (lane-dense loads/stores).
    x = x_ref[...].astype(jnp.float32)
    n = x.shape[0]
    mean = jnp.sum(x, axis=0, keepdims=True) / n              # (1, C)
    d = x - mean
    var = jnp.sum(d * d, axis=0, keepdims=True) / n + eps
    scale = jnp.exp(lg_ref[...]) * lax.rsqrt(var)
    y_ref[...] = (d * scale + bt_ref[...]).astype(y_ref.dtype)
    mean_ref[...] = mean
    var_ref[...] = var


def _stats_3d_kernel(x_ref, sum_ref, m2_ref):
    # Per-block partial stats: sum and centered M2 (block mean as pivot).
    x = x_ref[...].astype(jnp.float32)                        # (tb, C, tp)
    xs = jnp.sum(x, axis=0)                                   # batch first: pure VPU
    s = jnp.sum(xs, axis=-1, keepdims=True)                   # (C, 1), one lane reduce
    m = s / (x.shape[0] * x.shape[2])
    d = x - m[None, :, :]
    m2 = jnp.sum(jnp.sum(d * d, axis=0), axis=-1, keepdims=True)
    sum_ref[...] = s[None, None, :, :]                        # (1, 1, C, 1)
    m2_ref[...] = m2[None, None, :, :]


def _stats_2d_kernel(x_ref, sum_ref, m2_ref):
    x = x_ref[...].astype(jnp.float32)                        # (tb, C)
    s = jnp.sum(x, axis=0, keepdims=True)                     # (1, C)
    m = s / x.shape[0]
    d = x - m
    m2 = jnp.sum(d * d, axis=0, keepdims=True)
    sum_ref[...] = s[None, :, :]                              # (1, 1, C)
    m2_ref[...] = m2[None, :, :]


def _apply_kernel(x_ref, scale_ref, shift_ref, y_ref):
    # y = x * scale + shift — one FMA per element, per-channel broadcast.
    y_ref[...] = (x_ref[...] * scale_ref[...] + shift_ref[...]).astype(y_ref.dtype)


# --------------------------------------------------------------------------
# Tile selection
# --------------------------------------------------------------------------

def _pick_tp(C, P, itemsize, budget):
    """Lane-axis tile: whole P if one (C, P) slab fits the budget (or P is not a
    multiple of 128); otherwise the largest multiple of 128 dividing P that fits."""
    if P % 128 != 0 or C * P * itemsize <= budget:
        return P
    best = 128
    for tp in range(128, P + 1, 128):
        if P % tp == 0 and C * tp * itemsize <= budget:
            best = max(best, tp)
    return best


def _pick_tb_3d(B, row_bytes, budget, num_tc):
    limit = B
    if num_tc >= 2 and B > 1:
        limit = max(1, B // 2)   # keep >= 2 parallel grid steps for 2-TC chips only
    best = 1
    for tb in range(1, limit + 1):
        if B % tb == 0 and tb * row_bytes <= budget:
            best = tb
    return best


def _pick_tb_2d(B, row_bytes, budget, num_tc):
    # (tb, C) blocks: tb must be a multiple of 8 (sublane quantum) or equal B.
    limit = B
    if num_tc >= 2 and B > 1:
        limit = max(1, B // 2)
    cands = [t for t in range(1, B + 1) if B % t == 0 and (t % 8 == 0 or t == B)]
    best = None
    for t in cands:
        if t <= limit and t * row_bytes <= budget:
            best = t if best is None else max(best, t)
    return best if best is not None else min(cands)


# --------------------------------------------------------------------------
# pallas_call wrappers
# --------------------------------------------------------------------------

def _fused_train_3d(x3, lg, bt, eps, vmem_limit):
    B, C, P = x3.shape
    kern = functools.partial(_fused_train_3d_kernel, eps=float(eps))
    y, mean, var = pl.pallas_call(
        kern,
        out_shape=(jax.ShapeDtypeStruct((B, C, P), x3.dtype),
                   jax.ShapeDtypeStruct((C, 1), jnp.float32),
                   jax.ShapeDtypeStruct((C, 1), jnp.float32)),
        grid_spec=pltpu.PrefetchScalarGridSpec(
            num_scalar_prefetch=0,
            grid=(1,),
            in_specs=[pl.BlockSpec((B, C, P), lambda i: (0, 0, 0)),
                      pl.BlockSpec((C, 1), lambda i: (0, 0)),
                      pl.BlockSpec((C, 1), lambda i: (0, 0))],
            out_specs=[pl.BlockSpec((B, C, P), lambda i: (0, 0, 0)),
                       pl.BlockSpec((C, 1), lambda i: (0, 0)),
                       pl.BlockSpec((C, 1), lambda i: (0, 0))],
        ),
        compiler_params=pltpu.CompilerParams(
            dimension_semantics=("arbitrary",),
            vmem_limit_bytes=vmem_limit),
    )(x3, lg.reshape(C, 1), bt.reshape(C, 1))
    return y, mean.reshape(C), var.reshape(C)


def _fused_train_2d(x2, lg, bt, eps, vmem_limit):
    B, C = x2.shape
    kern = functools.partial(_fused_train_2d_kernel, eps=float(eps))
    y, mean, var = pl.pallas_call(
        kern,
        out_shape=(jax.ShapeDtypeStruct((B, C), x2.dtype),
                   jax.ShapeDtypeStruct((1, C), jnp.float32),
                   jax.ShapeDtypeStruct((1, C), jnp.float32)),
        grid_spec=pltpu.PrefetchScalarGridSpec(
            num_scalar_prefetch=0,
            grid=(1,),
            in_specs=[pl.BlockSpec((B, C), lambda i: (0, 0)),
                      pl.BlockSpec((1, C), lambda i: (0, 0)),
                      pl.BlockSpec((1, C), lambda i: (0, 0))],
            out_specs=[pl.BlockSpec((B, C), lambda i: (0, 0)),
                       pl.BlockSpec((1, C), lambda i: (0, 0)),
                       pl.BlockSpec((1, C), lambda i: (0, 0))],
        ),
        compiler_params=pltpu.CompilerParams(
            dimension_semantics=("arbitrary",),
            vmem_limit_bytes=vmem_limit),
    )(x2, lg.reshape(1, C), bt.reshape(1, C))
    return y, mean.reshape(C), var.reshape(C)


def _chan_combine(sums, m2s, n_block, n_total):
    """Chan et al. parallel-variance combine of per-block (sum, centered M2)."""
    mean = jnp.sum(sums, axis=0) / n_total
    mb = sums / n_block
    m2 = jnp.sum(m2s, axis=0) + n_block * jnp.sum((mb - mean[None, :]) ** 2, axis=0)
    var = jnp.maximum(m2 / n_total, 0.0)
    return mean, var


def _channel_stats_3d(x3, tb, tp, vmem_limit):
    B, C, P = x3.shape
    nb, npt = B // tb, P // tp
    sums, m2s = pl.pallas_call(
        _stats_3d_kernel,
        out_shape=(jax.ShapeDtypeStruct((nb, npt, C, 1), jnp.float32),
                   jax.ShapeDtypeStruct((nb, npt, C, 1), jnp.float32)),
        grid_spec=pltpu.PrefetchScalarGridSpec(
            num_scalar_prefetch=0,
            grid=(nb, npt),
            in_specs=[pl.BlockSpec((tb, C, tp), lambda i, j: (i, 0, j))],
            out_specs=[pl.BlockSpec((1, 1, C, 1), lambda i, j: (i, j, 0, 0)),
                       pl.BlockSpec((1, 1, C, 1), lambda i, j: (i, j, 0, 0))],
        ),
        compiler_params=pltpu.CompilerParams(
            dimension_semantics=("parallel", "parallel"),
            vmem_limit_bytes=vmem_limit),
    )(x3)
    return _chan_combine(sums.reshape(nb * npt, C), m2s.reshape(nb * npt, C),
                         tb * tp, B * P)


def _channel_stats_2d(x2, tb, vmem_limit):
    B, C = x2.shape
    nb = B // tb
    sums, m2s = pl.pallas_call(
        _stats_2d_kernel,
        out_shape=(jax.ShapeDtypeStruct((nb, 1, C), jnp.float32),
                   jax.ShapeDtypeStruct((nb, 1, C), jnp.float32)),
        grid_spec=pltpu.PrefetchScalarGridSpec(
            num_scalar_prefetch=0,
            grid=(nb,),
            in_specs=[pl.BlockSpec((tb, C), lambda i: (i, 0))],
            out_specs=[pl.BlockSpec((1, 1, C), lambda i: (i, 0, 0)),
                       pl.BlockSpec((1, 1, C), lambda i: (i, 0, 0))],
        ),
        compiler_params=pltpu.CompilerParams(
            dimension_semantics=("parallel",),
            vmem_limit_bytes=vmem_limit),
    )(x2)
    return _chan_combine(sums.reshape(nb, C), m2s.reshape(nb, C), tb, B)


def _apply_3d(x3, scale, shift, tb, tp, vmem_limit):
    B, C, P = x3.shape
    nb, npt = B // tb, P // tp
    return pl.pallas_call(
        _apply_kernel,
        out_shape=jax.ShapeDtypeStruct((B, C, P), x3.dtype),
        grid_spec=pltpu.PrefetchScalarGridSpec(
            num_scalar_prefetch=0,
            grid=(nb, npt),
            in_specs=[pl.BlockSpec((tb, C, tp), lambda i, j: (i, 0, j)),
                      pl.BlockSpec((1, C, 1), lambda i, j: (0, 0, 0)),
                      pl.BlockSpec((1, C, 1), lambda i, j: (0, 0, 0))],
            out_specs=pl.BlockSpec((tb, C, tp), lambda i, j: (i, 0, j)),
        ),
        compiler_params=pltpu.CompilerParams(
            dimension_semantics=("parallel", "parallel"),
            vmem_limit_bytes=vmem_limit),
    )(x3, scale.reshape(1, C, 1), shift.reshape(1, C, 1))


def _apply_2d(x2, scale, shift, tb, vmem_limit):
    B, C = x2.shape
    nb = B // tb
    return pl.pallas_call(
        _apply_kernel,
        out_shape=jax.ShapeDtypeStruct((B, C), x2.dtype),
        grid_spec=pltpu.PrefetchScalarGridSpec(
            num_scalar_prefetch=0,
            grid=(nb,),
            in_specs=[pl.BlockSpec((tb, C), lambda i: (i, 0)),
                      pl.BlockSpec((1, C), lambda i: (0, 0)),
                      pl.BlockSpec((1, C), lambda i: (0, 0))],
            out_specs=pl.BlockSpec((tb, C), lambda i: (i, 0)),
        ),
        compiler_params=pltpu.CompilerParams(
            dimension_semantics=("parallel",),
            vmem_limit_bytes=vmem_limit),
    )(x2, scale.reshape(1, C), shift.reshape(1, C))


# --------------------------------------------------------------------------
# Forward pass
# --------------------------------------------------------------------------

def batchnorm_forward(x, log_det_jacob, log_gamma, beta,
                      running_mean, running_var, *,
                      training=True, momentum=0.1, eps=1e-5,
                      force_tiled=False,
                      apply_budget_bytes=None, stats_budget_bytes=None):
    """Pallas implementation of BatchNorm.forward(x, log_det_jacob).

    x:              (B, C, *spatial) or (B, C)
    log_det_jacob:  scalar or (B,)
    log_gamma / beta / running_mean / running_var: C elements (any shape).

    Returns (y, log_det_jacob_out, new_running_mean, new_running_var,
             batch_mean, batch_var).  Buffers are returned (not mutated).
    """
    cfg = _tpu_config()
    vmem_limit = cfg["vmem_limit"]
    apply_budget = apply_budget_bytes or cfg["apply_budget"]
    stats_budget = stats_budget_bytes or cfg["stats_budget"]
    num_tc = cfg["num_tc"]

    B, C = x.shape[0], x.shape[1]
    P = int(math.prod(x.shape[2:])) if x.ndim > 2 else 1
    itemsize = x.dtype.itemsize
    use_2d = (P == 1)
    fits_fused = (not force_tiled) and (B * C * P * 4 <= cfg["fused_max_x_bytes"])
    # TODO(synk): for C < 8 with very large P, fold C into the lane axis
    # ((B*C, P) view) to avoid the sublane pad from C -> 8 doubling block VMEM.

    lg = log_gamma.reshape(C).astype(jnp.float32)
    bt = beta.reshape(C).astype(jnp.float32)
    rm = running_mean.reshape(C).astype(jnp.float32)
    rv = running_var.reshape(C).astype(jnp.float32)

    y = None
    if training:
        if fits_fused:
            # Single pass over x: stats + normalize + affine fused (2N HBM bytes).
            if use_2d:
                y2, mean, var = _fused_train_2d(x.reshape(B, C), lg, bt, eps, vmem_limit)
                y = y2.reshape(x.shape)
            else:
                y3, mean, var = _fused_train_3d(x.reshape(B, C, P), lg, bt, eps, vmem_limit)
                y = y3.reshape(x.shape)
        else:
            # Two-pass: tiled partial stats (Chan combine), then tiled apply.
            if use_2d:
                tb_s = _pick_tb_2d(B, C * itemsize, stats_budget, num_tc)
                mean, var = _channel_stats_2d(x.reshape(B, C), tb_s, vmem_limit)
            else:
                tp_s = _pick_tp(C, P, itemsize, stats_budget)
                tb_s = _pick_tb_3d(B, C * tp_s * itemsize, stats_budget, num_tc)
                mean, var = _channel_stats_3d(x.reshape(B, C, P), tb_s, tp_s, vmem_limit)
            var = var + eps
        new_rm = rm * (1.0 - momentum) + mean * momentum
        new_rv = rv * (1.0 - momentum) + var * momentum
        batch_mean, batch_var = mean, var
    else:
        mean, var = rm, rv
        new_rm, new_rv = rm, rv
        batch_mean, batch_var = rm, rv

    if y is None:
        # Eval mode, or training via the tiled two-pass path: fold normalization
        # and affine into one FMA per element:  y = x*scale + shift.
        scale = jnp.exp(lg) * lax.rsqrt(var)
        shift = bt - mean * scale
        if use_2d:
            tb_a = _pick_tb_2d(B, C * itemsize, apply_budget, num_tc)
            y = _apply_2d(x.reshape(B, C), scale, shift, tb_a, vmem_limit).reshape(x.shape)
        else:
            tp_a = _pick_tp(C, P, itemsize, apply_budget)
            tb_a = _pick_tb_3d(B, C * tp_a * itemsize, apply_budget, num_tc)
            y = _apply_3d(x.reshape(B, C, P), scale, shift, tb_a, tp_a,
                          vmem_limit).reshape(x.shape)

    # Scalar log-det contribution (C-element reduction, done in the wrapper).
    log_det = jnp.sum(lg - 0.5 * jnp.log(var)) * float(P)
    ldj_out = log_det_jacob + log_det

    return (
        y,
        ldj_out,
        new_rm.reshape(running_mean.shape).astype(running_mean.dtype),
        new_rv.reshape(running_var.shape).astype(running_var.dtype),
        batch_mean.reshape(running_mean.shape),
        batch_var.reshape(running_var.shape),
    )


# --------------------------------------------------------------------------
# Pure-JAX reference (transcription of the PyTorch BatchNorm.forward)
# --------------------------------------------------------------------------

def _reference_forward(x, log_det_jacob, log_gamma, beta,
                       running_mean, running_var, *, training, momentum, eps):
    B, C = x.shape[0], x.shape[1]
    P = int(math.prod(x.shape[2:])) if x.ndim > 2 else 1
    xr = x.reshape(B, C, P)
    lg = log_gamma.reshape(C)
    bt = beta.reshape(C)
    rm = running_mean.reshape(C)
    rv = running_var.reshape(C)
    if training:
        m = jnp.mean(xr, axis=(0, 2))
        v = jnp.mean((xr - m[None, :, None]) ** 2, axis=(0, 2)) + eps
        new_rm = rm * (1.0 - momentum) + m * momentum
        new_rv = rv * (1.0 - momentum) + v * momentum
    else:
        m, v = rm, rv
        new_rm, new_rv = rm, rv
    y = (xr - m[None, :, None]) / jnp.sqrt(v)[None, :, None]
    y = y * jnp.exp(lg)[None, :, None] + bt[None, :, None]
    log_det = jnp.sum(lg - 0.5 * jnp.log(v)) * P
    return y.reshape(x.shape), log_det_jacob + log_det, new_rm, new_rv


if __name__ == "__main__":
    key = jax.random.PRNGKey(0)
    kx, kl, kg, kb, km, kv, kx2 = jax.random.split(key, 7)

    # ---------------- 4-D conv-style input: (B, C, H, W) ----------------
    B, C, H, W = 2, 4, 16, 16
    x = 1.5 * jax.random.normal(kx, (B, C, H, W), jnp.float32) + 0.3
    log_det_jacob = jax.random.normal(kl, (B,), jnp.float32)
    log_gamma = 0.1 * jax.random.normal(kg, (1, C, 1, 1), jnp.float32)
    beta = 0.1 * jax.random.normal(kb, (1, C, 1, 1), jnp.float32)
    running_mean = 0.1 * jax.random.normal(km, (1, C, 1, 1), jnp.float32)
    running_var = 1.0 + 0.1 * jax.random.uniform(kv, (1, C, 1, 1), jnp.float32)

    y_ref, ldj_ref, rm_ref, rv_ref = _reference_forward(
        x, log_det_jacob, log_gamma, beta, running_mean, running_var,
        training=True, momentum=0.1, eps=1e-5)

    # --- training, fused single-pass path ---
    y, ldj, nrm, nrv, _, _ = batchnorm_forward(
        x, log_det_jacob, log_gamma, beta, running_mean, running_var,
        training=True, momentum=0.1, eps=1e-5)
    jax.block_until_ready((y, ldj, nrm, nrv))
    assert jnp.allclose(y, y_ref, atol=1e-4, rtol=1e-4), "fused train y mismatch"
    assert jnp.allclose(ldj, ldj_ref, atol=1e-4, rtol=1e-4), "fused train log_det mismatch"
    assert jnp.allclose(nrm.reshape(-1), rm_ref, atol=1e-5, rtol=1e-5), "running_mean mismatch"
    assert jnp.allclose(nrv.reshape(-1), rv_ref, atol=1e-4, rtol=1e-4), "running_var mismatch"

    # --- training, forced tiled path (exercises P tiling + Chan combine) ---
    y_t, ldj_t, nrm_t, nrv_t, _, _ = batchnorm_forward(
        x, log_det_jacob, log_gamma, beta, running_mean, running_var,
        training=True, momentum=0.1, eps=1e-5,
        force_tiled=True, apply_budget_bytes=2048, stats_budget_bytes=2048)
    jax.block_until_ready((y_t, ldj_t))
    assert jnp.allclose(y_t, y_ref, atol=1e-4, rtol=1e-4), "tiled train y mismatch"
    assert jnp.allclose(ldj_t, ldj_ref, atol=1e-4, rtol=1e-4), "tiled train log_det mismatch"
    assert jnp.allclose(nrv_t.reshape(-1), rv_ref, atol=1e-4, rtol=1e-4), "tiled running_var mismatch"

    # --- eval mode (uses running stats, apply-only path) ---
    y_eref, ldj_eref, _, _ = _reference_forward(
        x, log_det_jacob, log_gamma, beta, running_mean, running_var,
        training=False, momentum=0.1, eps=1e-5)
    y_e, ldj_e, _, _, _, _ = batchnorm_forward(
        x, log_det_jacob, log_gamma, beta, running_mean, running_var,
        training=False, momentum=0.1, eps=1e-5)
    jax.block_until_ready((y_e, ldj_e))
    assert jnp.allclose(y_e, y_eref, atol=1e-4, rtol=1e-4), "eval y mismatch"
    assert jnp.allclose(ldj_e, ldj_eref, atol=1e-4, rtol=1e-4), "eval log_det mismatch"

    # ---------------- 2-D tabular input: (B, C), P == 1 ----------------
    B2, C2 = 16, 8
    x2 = jax.random.normal(kx2, (B2, C2), jnp.float32) + 0.5
    ldj2 = jnp.zeros((B2,), jnp.float32)
    lg2 = 0.1 * jax.random.normal(kg, (1, C2), jnp.float32)
    bt2 = 0.1 * jax.random.normal(kb, (1, C2), jnp.float32)
    rm2 = jnp.zeros((1, C2), jnp.float32)
    rv2 = jnp.ones((1, C2), jnp.float32)

    y2_ref, l2_ref, rm2_ref, rv2_ref = _reference_forward(
        x2, ldj2, lg2, bt2, rm2, rv2, training=True, momentum=0.1, eps=1e-5)

    y2, l2, nrm2, nrv2, _, _ = batchnorm_forward(
        x2, ldj2, lg2, bt2, rm2, rv2, training=True, momentum=0.1, eps=1e-5)
    jax.block_until_ready((y2, l2))
    assert jnp.allclose(y2, y2_ref, atol=1e-4, rtol=1e-4), "2d fused y mismatch"
    assert jnp.allclose(l2, l2_ref, atol=1e-4, rtol=1e-4), "2d fused log_det mismatch"
    assert jnp.allclose(nrv2.reshape(-1), rv2_ref, atol=1e-4, rtol=1e-4), "2d running_var mismatch"

    y2t, l2t, _, nrv2t, _, _ = batchnorm_forward(
        x2, ldj2, lg2, bt2, rm2, rv2, training=True, momentum=0.1, eps=1e-5,
        force_tiled=True, apply_budget_bytes=256, stats_budget_bytes=512)
    jax.block_until_ready((y2t, l2t))
    assert jnp.allclose(y2t, y2_ref, atol=1e-4, rtol=1e-4), "2d tiled y mismatch"
    assert jnp.allclose(l2t, l2_ref, atol=1e-4, rtol=1e-4), "2d tiled log_det mismatch"
    assert jnp.allclose(nrv2t.reshape(-1), rv2_ref, atol=1e-4, rtol=1e-4), "2d tiled running_var mismatch"

    print("KERNEL_OK")
</pallas_src>

<mosaic_0001>
module attributes {stable_mosaic.version = 11 : i64} {
  func.func @_fused_train_3d_kernel(%arg0: i32, %arg1: memref<2x4x256xf32, #tpu.memory_space<vmem>>, %arg2: memref<4x1xf32, #tpu.memory_space<vmem>>, %arg3: memref<4x1xf32, #tpu.memory_space<vmem>>, %arg4: memref<2x4x256xf32, #tpu.memory_space<vmem>>, %arg5: memref<4x1xf32, #tpu.memory_space<vmem>>, %arg6: memref<4x1xf32, #tpu.memory_space<vmem>>) attributes {dimension_semantics = [#tpu.dimension_semantics<arbitrary>], iteration_bounds = array<i64: 1>, scalar_prefetch = 0 : i64, scratch_operands = 0 : i64, tpu.core_type = #tpu.core_type<tc>, window_params = [{pipeline_mode = #tpu.pipeline_mode<synchronous>, transform_indices = @transform_0, window_bounds = array<i64: 2, 4, 256>}, {pipeline_mode = #tpu.pipeline_mode<synchronous>, transform_indices = @transform_1, window_bounds = array<i64: 4, 1>}, {pipeline_mode = #tpu.pipeline_mode<synchronous>, transform_indices = @transform_2, window_bounds = array<i64: 4, 1>}, {pipeline_mode = #tpu.pipeline_mode<synchronous>, transform_indices = @transform_3, window_bounds = array<i64: 2, 4, 256>}, {pipeline_mode = #tpu.pipeline_mode<synchronous>, transform_indices = @transform_4, window_bounds = array<i64: 4, 1>}, {pipeline_mode = #tpu.pipeline_mode<synchronous>, transform_indices = @transform_5, window_bounds = array<i64: 4, 1>}]} {
    %c0 = arith.constant 0 : index
    %c0_0 = arith.constant 0 : index
    %c0_1 = arith.constant 0 : index
    %0 = vector.load %arg1[%c0, %c0_0, %c0_1] : memref<2x4x256xf32, #tpu.memory_space<vmem>>, vector<2x4x256xf32>
    %cst = arith.constant dense<0.000000e+00> : vector<4x256xf32>
    %1 = vector.multi_reduction <add>, %0, %cst [0] : vector<2x4x256xf32> to vector<4x256xf32>
    %cst_2 = arith.constant dense<0.000000e+00> : vector<4xf32>
    %2 = vector.multi_reduction <add>, %1, %cst_2 [1] : vector<4x256xf32> to vector<4xf32>
    %3 = vector.shape_cast %2 : vector<4xf32> to vector<4x1xf32>
    %cst_3 = arith.constant 5.120000e+02 : f32
    %4 = vector.broadcast %cst_3 : f32 to vector<4x1xf32>
    %5 = arith.divf %3, %4 : vector<4x1xf32>
    %6 = vector.shape_cast %5 : vector<4x1xf32> to vector<1x4x1xf32>
    %7 = vector.broadcast %6 : vector<1x4x1xf32> to vector<2x4x256xf32>
    %8 = arith.subf %0, %7 : vector<2x4x256xf32>
    %9 = arith.mulf %8, %8 : vector<2x4x256xf32>
    %cst_4 = arith.constant dense<0.000000e+00> : vector<4x256xf32>
    %10 = vector.multi_reduction <add>, %9, %cst_4 [0] : vector<2x4x256xf32> to vector<4x256xf32>
    %cst_5 = arith.constant dense<0.000000e+00> : vector<4xf32>
    %11 = vector.multi_reduction <add>, %10, %cst_5 [1] : vector<4x256xf32> to vector<4xf32>
    %12 = vector.shape_cast %11 : vector<4xf32> to vector<4x1xf32>
    %cst_6 = arith.constant 5.120000e+02 : f32
    %13 = vector.broadcast %cst_6 : f32 to vector<4x1xf32>
    %14 = arith.divf %12, %13 : vector<4x1xf32>
    %cst_7 = arith.constant 9.99999974E-6 : f32
    %15 = vector.broadcast %cst_7 : f32 to vector<4x1xf32>
    %16 = arith.addf %14, %15 : vector<4x1xf32>
    %c0_8 = arith.constant 0 : index
    %c0_9 = arith.constant 0 : index
    %17 = vector.load %arg2[%c0_8, %c0_9] : memref<4x1xf32, #tpu.memory_space<vmem>>, vector<4x1xf32>
    %18 = math.exp %17 : vector<4x1xf32>
    %19 = math.rsqrt %16 : vector<4x1xf32>
    %20 = arith.mulf %18, %19 : vector<4x1xf32>
    %21 = vector.shape_cast %20 : vector<4x1xf32> to vector<1x4x1xf32>
    %22 = vector.broadcast %21 : vector<1x4x1xf32> to vector<2x4x256xf32>
    %23 = arith.mulf %8, %22 : vector<2x4x256xf32>
    %c0_10 = arith.constant 0 : index
    %c0_11 = arith.constant 0 : index
    %24 = vector.load %arg3[%c0_10, %c0_11] : memref<4x1xf32, #tpu.memory_space<vmem>>, vector<4x1xf32>
    %25 = vector.shape_cast %24 : vector<4x1xf32> to vector<1x4x1xf32>
    %26 = vector.broadcast %25 : vector<1x4x1xf32> to vector<2x4x256xf32>
    %27 = arith.addf %23, %26 : vector<2x4x256xf32>
    %c0_12 = arith.constant 0 : index
    %c0_13 = arith.constant 0 : index
    %c0_14 = arith.constant 0 : index
    %28 = vector.load %arg4[%c0_12, %c0_13, %c0_14] : memref<2x4x256xf32, #tpu.memory_space<vmem>>, vector<2x4x256xf32>
    tpu.vector_store %arg4[%c0_12, %c0_13, %c0_14], %27 {strides = array<i32>} : memref<2x4x256xf32, #tpu.memory_space<vmem>>, vector<2x4x256xf32>,
    %c0_15 = arith.constant 0 : index
    %c0_16 = arith.constant 0 : index
    %29 = vector.load %arg5[%c0_15, %c0_16] : memref<4x1xf32, #tpu.memory_space<vmem>>, vector<4x1xf32>
    tpu.vector_store %arg5[%c0_15, %c0_16], %5 {strides = array<i32>} : memref<4x1xf32, #tpu.memory_space<vmem>>, vector<4x1xf32>,
    %c0_17 = arith.constant 0 : index
    %c0_18 = arith.constant 0 : index
    %30 = vector.load %arg6[%c0_17, %c0_18] : memref<4x1xf32, #tpu.memory_space<vmem>>, vector<4x1xf32>
    tpu.vector_store %arg6[%c0_17, %c0_18], %16 {strides = array<i32>} : memref<4x1xf32, #tpu.memory_space<vmem>>, vector<4x1xf32>,
    return
  }
  func.func @transform_0(%arg0: i32) -> (i32, i32, i32) {
    %c0_i32 = arith.constant 0 : i32
    %c0_i32_0 = arith.constant 0 : i32
    %c0_i32_1 = arith.constant 0 : i32
    %c0_i32_2 = arith.constant 0 : i32
    return %c0_i32, %c0_i32_0, %c0_i32_1 : i32, i32, i32
  }
  func.func @transform_1(%arg0: i32) -> (i32, i32) {
    %c0_i32 = arith.constant 0 : i32
    %c0_i32_0 = arith.constant 0 : i32
    %c0_i32_1 = arith.constant 0 : i32
    return %c0_i32, %c0_i32_0 : i32, i32
  }
  func.func @transform_2(%arg0: i32) -> (i32, i32) {
    %c0_i32 = arith.constant 0 : i32
    %c0_i32_0 = arith.constant 0 : i32
    %c0_i32_1 = arith.constant 0 : i32
    return %c0_i32, %c0_i32_0 : i32, i32
  }
  func.func @transform_3(%arg0: i32) -> (i32, i32, i32) {
    %c0_i32 = arith.constant 0 : i32
    %c0_i32_0 = arith.constant 0 : i32
    %c0_i32_1 = arith.constant 0 : i32
    %c0_i32_2 = arith.constant 0 : i32
    return %c0_i32, %c0_i32_0, %c0_i32_1 : i32, i32, i32
  }
  func.func @transform_4(%arg0: i32) -> (i32, i32) {
    %c0_i32 = arith.constant 0 : i32
    %c0_i32_0 = arith.constant 0 : i32
    %c0_i32_1 = arith.constant 0 : i32
    return %c0_i32, %c0_i32_0 : i32, i32
  }
  func.func @transform_5(%arg0: i32) -> (i32, i32) {
    %c0_i32 = arith.constant 0 : i32
    %c0_i32_0 = arith.constant 0 : i32
    %c0_i32_1 = arith.constant 0 : i32
    return %c0_i32, %c0_i32_0 : i32, i32
  }
}

</mosaic_0001>

<bundles_post_ra>
// kernel: tpu_custom_call.1
= control target key start
LH: loop header
LB: loop body
LE: loop exit
PB: predicated region body
PF: predicated region fallthrough
CT: control target
= control target key end

     0   :  { %11 = vsyncpa [#allocation3], 0  ;;  %s506_s0 = inlined_call_operand.hbm [shape: f32[2,4,256], index: 0, kind: input, shape index: {}]   ;;  %s507_s1 = inlined_call_operand.hbm [shape: f32[4,1], index: 1, kind: input, shape index: {}]   ;;  %s508_s2 = inlined_call_operand.hbm [shape: f32[4,1], index: 2, kind: input, shape index: {}]   ;;  %s509_s3 = inlined_call_operand.hbm [shape: f32[2,4,256], index: 3, kind: output, shape index: {0}]   ;;  %s510_s4 = inlined_call_operand.hbm [shape: f32[4,1], index: 4, kind: output, shape index: {1}]   ;;  %s511_s5 = inlined_call_operand.hbm [shape: f32[4,1], index: 5, kind: output, shape index: {2}]  }
   0x1   :  { %12 = vsyncpa [#allocation6], 0 }
   0x2   :  { %13 = vsyncpa [#allocation4], 0 }
   0x3   :  { %14 = vsyncpa [#allocation10], 0  ;;  %s352_s18 = smov [#allocation5]   ;;  %s353_s20 = smov [#allocation2]  }
   0x4   :  { %s33_s19 = sshll.u32 %s352_s18, 4  ;;  %s20_s21 = sshll.u32 %s353_s20, 4  ;;  %s34_s19 = int_to_ptr.vmem [resolvable:$true] %s33_s19  ;;  %s392_s21 = int_to_ptr.vmem [resolvable:$true] %s20_s21 }
   0x5   :  { %s212_s24 = scalar_lea.hbm %s507_s1, 64 }
   0x6   :  { %p213_p0 = scmp.ne.s32.totalorder %s507_s1, %s212_s24  ;;  %p216_p1 = scmp.lt.u32.totalorder %s212_s24, %s507_s1 }
   0x8   :  { %p218_p2 = pnand %p216_p1, %p213_p0 }
   0xa   :  { %221 = shalt.err (!%p218_p2)
}
   0xb   :  { %s222_s29 = scalar_lea.vmem %s34_s19, 64  ;;  %p227_p4 = scmp.lt.s32.totalorder %s34_s19, %s34_s19 }
   0xc   :  { %p223_p3 = scmp.ne.s32.totalorder %s34_s19, %s222_s29  ;;  %p228_p5 = scmp.lt.s32.totalorder %s222_s29, %s222_s29 }
   0xe   :  { %p229_p6 = por %p228_p5, %p227_p4 }
  0x10   :  { %p230_p7 = pnand %p229_p6, %p223_p3 }
  0x12   :  { %233 = shalt.err (!%p230_p7)
}
  0x13   :  { %36 = dma.hbm_to_vmem [thread:$0]  %s507_s1, 64, %s34_s19, [#allocation6]  }
  0x14   :  { %s234_s9 = scalar_lea.hbm %s506_s0, 256 }
  0x15   :  { %p235_p8 = scmp.ne.s32.totalorder %s506_s0, %s234_s9  ;;  %p238_p9 = scmp.lt.u32.totalorder %s234_s9, %s506_s0 }
  0x17   :  { %p240_p10 = pnand %p238_p9, %p235_p8 }
  0x19   :  { %243 = shalt.err (!%p240_p10)
}
  0x1a   :  { %s244_s14 = scalar_lea.vmem %s392_s21, 256  ;;  %p249_p12 = scmp.lt.s32.totalorder %s392_s21, %s392_s21 }
  0x1b   :  { %p245_p11 = scmp.ne.s32.totalorder %s392_s21, %s244_s14  ;;  %p250_p13 = scmp.lt.s32.totalorder %s244_s14, %s244_s14 }
  0x1d   :  { %p251_p0 = por %p250_p13, %p249_p12 }
  0x1f   :  { %p252_p1 = pnand %p251_p0, %p245_p11 }
  0x21   :  { %255 = shalt.err (!%p252_p1)
}
  0x22   :  { %s354_s1 = smov 128   ;;  %s355_s15 = smov 8  }
  0x23   :  { %26 = dma.hbm_to_vmem [thread:$0]  %s506_s0, 256, %s392_s21, [#allocation3], %s354_s1, %s354_s1, %s355_s15  }
  0x24   :  { %s356_s18 = smov [#allocation7]   ;;  %s256_s23 = scalar_lea.hbm %s508_s2, 64 }
  0x25   :  { %s43_s19 = sshll.u32 %s356_s18, 4  ;;  %p257_p2 = scmp.ne.s32.totalorder %s508_s2, %s256_s23  ;;  %s44_s19 = int_to_ptr.vmem [resolvable:$true] %s43_s19 }
  0x26   :  { %p260_p3 = scmp.lt.u32.totalorder %s256_s23, %s508_s2 }
  0x28   :  { %p262_p4 = pnand %p260_p3, %p257_p2 }
  0x2a   :  { %265 = shalt.err (!%p262_p4)
}
  0x2b   :  { %s266_s28 = scalar_lea.vmem %s44_s19, 64  ;;  %p271_p6 = scmp.lt.s32.totalorder %s44_s19, %s44_s19 }
  0x2c   :  { %p267_p5 = scmp.ne.s32.totalorder %s44_s19, %s266_s28  ;;  %p272_p7 = scmp.lt.s32.totalorder %s266_s28, %s266_s28 }
  0x2e   :  { %p273_p8 = por %p272_p7, %p271_p6 }
  0x30   :  { %p274_p9 = pnand %p273_p8, %p267_p5 }
  0x32   :  { %277 = shalt.err (!%p274_p9)
}
  0x33   :  { %46 = dma.hbm_to_vmem [thread:$0]  %s508_s2, 64, %s44_s19, [#allocation6]  }
  0x34   :  { %344 = dma.done.wait [#allocation3], 256  }
  0x35   :  { %345 = vsyncadd [#allocation3], 4294967040 }
  0x36   :  { %346 = dma.done.wait [#allocation6], 128  }
  0x37   :  { %347 = vsyncadd [#allocation6], 4294967168  ;;  %vm64_vm0 = vcmask 1043456   ;;  %v56_v0 = vld [vmem:[#allocation2] sm:$0xff]  ;;  %v57_v1 = vld [vmem:[#allocation2 + $0x8] sm:$0xff]  ;;  %v82_v15 = vlaneseq  ;;  %vm146_vm1 = vcmask 3072  }
  0x38   :  { %v60_v2 = vcombine.high %v56_v0, %v56_v0  ;;  %v61_v3 = vcombine.high %v57_v1, %v57_v1  ;;  %v65_v4 = vsel %vm64_vm0, %v56_v0, 0.0  ;;  %v66_v5 = vsel %vm64_vm0, %v57_v1, 0.0  ;;  %v110_v38 = vld [vmem:[#allocation5] sm:$0xf]  ;;  %v129_v46 = vld [vmem:[#allocation7] sm:$0xf] }
  0x39   :  { %v67_v6 = vadd.f32 %v66_v5, %v65_v4  ;;  %v357_v13 = vmov 839922192   ;;  %v83_v17 = vshrl.u32 %v82_v15, 7  ;;  %v358_v37 = vmov 0   ;;  %s359_s2 = smov [#allocation9]  }
  0x3a   :  { %v68_v7 = vsel %vm64_vm0, %v60_v2, 0.0  ;;  %v69_v8 = vsel %vm64_vm0, %v61_v3, 0.0  ;;  %v80_v14 = vunpack.c.l.s4 %v357_v13  ;;  %204 = vset.pattern.permute.xlu1 %v358_v37  ;;  %205 = vset.pattern.permute.xlu0 %v358_v37  ;;  %v111_v39 = vmul.f32 1.442695, %v110_v38  ;;  %s167_s29 = sshll.u32 %s359_s2, 4  ;;  %s168_s29 = int_to_ptr.vmem [resolvable:$true] %s167_s29 }
  0x3b   :  { %v70_v9 = vadd.f32 %v69_v8, %v68_v7  ;;  %v71_v10 = vsel %vm64_vm0, %v67_v6, 0.0  ;;  %s278_s30 = scalar_lea.vmem %s168_s29, 64  ;;  %p283_p11 = scmp.lt.s32.totalorder %s168_s29, %s168_s29 }
  0x3c   :  { %v81_v16 = vunpack.c.0.s8 %v80_v14  ;;  %208 = vpow2.f32 %v111_v39  ;;  %p279_p10 = scmp.ne.s32.totalorder %s168_s29, %s278_s30  ;;  %p284_p12 = scmp.lt.s32.totalorder %s278_s30, %s278_s30 }
  0x3d   :  { %v72_v11 = vsel %vm64_vm0, %v70_v9, 0.0 }
  0x3e   :  { %v73_v12 = vadd.f32 %v72_v11, %v71_v10  ;;  %v444_v18 = vsub.s32 %v81_v16, %v83_v17  ;;  %p285_p13 = por %p284_p12, %p283_p11 }
  0x40   :  { %74 = vadd.xlane.f32.xlu0 %v73_v12  ;;  %p286_p0 = pnand %p285_p13, %p279_p10 }
  0x46   :  { %v209_v43 = vpop.eup %208 }
  0xcd   :  { %v75_v19 = vpop.xlane.xlu0 %74 }
  0xce   :  { %v77_v20 = vmul.f32 0.001953125, %v75_v19 }
  0xd0   :  { %v85_v21 = vrot.slane %v77_v20, %v444_v18  ;;  %147 = vst.msk [vmem:[#allocation9] sm:$0xf] %vm146_vm1, %v77_v20 }
  0xd2   :  { %v448_v22 = vsub.f32 %v56_v0, %v85_v21  ;;  %v450_v23 = vsub.f32 %v57_v1, %v85_v21 }
  0xd4   :  { %v89_v24 = vmul.f32 %v448_v22, %v448_v22  ;;  %v90_v25 = vmul.f32 %v450_v23, %v450_v23 }
  0xd6   :  { %v93_v26 = vcombine.high %v89_v24, %v89_v24  ;;  %v94_v27 = vcombine.high %v90_v25, %v90_v25  ;;  %v97_v28 = vsel %vm64_vm0, %v89_v24, 0.0  ;;  %v98_v29 = vsel %vm64_vm0, %v90_v25, 0.0 }
  0xd7   :  { %v99_v30 = vadd.f32 %v98_v29, %v97_v28 }
  0xd8   :  { %v100_v31 = vsel %vm64_vm0, %v93_v26, 0.0  ;;  %v101_v32 = vsel %vm64_vm0, %v94_v27, 0.0 }
  0xd9   :  { %v102_v33 = vadd.f32 %v101_v32, %v100_v31  ;;  %v103_v34 = vsel %vm64_vm0, %v99_v30, 0.0 }
  0xdb   :  { %v104_v35 = vsel %vm64_vm0, %v102_v33, 0.0 }
  0xdc   :  { %v105_v36 = vadd.f32 %v104_v35, %v103_v34 }
  0xde   :  { %106 = vadd.xlane.f32.xlu0 %v105_v36 }
 0x16b   :  { %v107_v40 = vpop.xlane.xlu0 %106 }
 0x16c   :  { %v108_v41 = vmul.f32 0.001953125, %v107_v40 }
 0x16e   :  { %v109_v42 = vadd.f32 1e-05, %v108_v41 }
 0x170   :  { %210 = vrsqrt.f32 %v109_v42  ;;  %148 = vst.msk [vmem:[#allocation11] sm:$0xf] %vm146_vm1, %v109_v42 }
 0x17a   :  { %v211_v44 = vpop.eup %210 }
 0x17b   :  { %v114_v45 = vmul.f32 %v211_v44, %v209_v43 }
 0x17d   :  { %117 = vperm.xlu1 %204, %v114_v45  }
 0x181   :  { %132 = vperm.xlu1 %204, %v129_v46  }
 0x182   :  { %289 = shalt.err (!%p286_p0)
}
 0x183   :  { %s290_s8 = scalar_lea.hbm %s510_s4, 64 }
 0x184   :  { %p291_p1 = scmp.ne.s32.totalorder %s510_s4, %s290_s8  ;;  %p294_p2 = scmp.lt.u32.totalorder %s290_s8, %s510_s4 }
 0x186   :  { %p296_p3 = pnand %p294_p2, %p291_p1 }
 0x188   :  { %299 = shalt.err (!%p296_p3)
}
 0x189   :  { %170 = dma.vmem_to_hbm [thread:$0]  %s168_s29, 64, %s510_s4, [#allocation10]  }
 0x18a   :  { %s360_s16 = smov [#allocation11]  }
 0x18b   :  { %s177_s17 = sshll.u32 %s360_s16, 4  ;;  %s178_s17 = int_to_ptr.vmem [resolvable:$true] %s177_s17 }
 0x18c   :  { %s300_s18 = scalar_lea.vmem %s178_s17, 64  ;;  %p305_p5 = scmp.lt.s32.totalorder %s178_s17, %s178_s17 }
 0x18d   :  { %p301_p4 = scmp.ne.s32.totalorder %s178_s17, %s300_s18  ;;  %p306_p6 = scmp.lt.s32.totalorder %s300_s18, %s300_s18 }
 0x18f   :  { %p307_p7 = por %p306_p6, %p305_p5 }
 0x191   :  { %p308_p8 = pnand %p307_p7, %p301_p4 }
 0x193   :  { %311 = shalt.err (!%p308_p8)
}
 0x194   :  { %s312_s22 = scalar_lea.hbm %s511_s5, 64 }
 0x195   :  { %p313_p9 = scmp.ne.s32.totalorder %s511_s5, %s312_s22  ;;  %p316_p10 = scmp.lt.u32.totalorder %s312_s22, %s511_s5 }
 0x197   :  { %p318_p11 = pnand %p316_p10, %p313_p9 }
 0x199   :  { %321 = shalt.err (!%p318_p11)
}
 0x19a   :  { %180 = dma.vmem_to_hbm [thread:$0]  %s178_s17, 64, %s511_s5, [#allocation10]  }
 0x19b   :  { %s361_s28 = smov [#allocation8]  }
 0x19c   :  { %s154_s0 = sshll.u32 %s361_s28, 4  ;;  %s155_s0 = int_to_ptr.vmem [resolvable:$true] %s154_s0 }
 0x19d   :  { %s322_s21 = scalar_lea.vmem %s155_s0, 256  ;;  %p327_p13 = scmp.lt.s32.totalorder %s155_s0, %s155_s0 }
 0x19e   :  { %p323_p12 = scmp.ne.s32.totalorder %s155_s0, %s322_s21  ;;  %p328_p0 = scmp.lt.s32.totalorder %s322_s21, %s322_s21 }
 0x1a0   :  { %p329_p1 = por %p328_p0, %p327_p13 }
 0x1a2   :  { %p330_p2 = pnand %p329_p1, %p323_p12 }
 0x1fc   :  { %v118_v47 = vpop.permute.xlu1 %117 }
 0x1fd   :  { %v125_v48 = vrot.slane %v118_v47, %v444_v18 }
 0x1ff   :  { %v127_v50 = vmul.f32 %v125_v48, %v448_v22  ;;  %v128_v51 = vmul.f32 %v125_v48, %v450_v23 }
 0x200   :  { %v133_v49 = vpop.permute.xlu1 %132 }
 0x201   :  { %v140_v52 = vrot.slane %v133_v49, %v444_v18 }
 0x203   :  { %v142_v53 = vadd.f32 %v140_v52, %v127_v50  ;;  %v143_v54 = vadd.f32 %v140_v52, %v128_v51 }
 0x205   :  { %144 = vst [vmem:[#allocation8] sm:$0xff] %v142_v53  ;;  %145 = vst [vmem:[#allocation8 + $0x8] sm:$0xff] %v143_v54 }
 0x206   :  { %333 = shalt.err (!%p330_p2)
}
 0x207   :  { %s334_s29 = scalar_lea.hbm %s509_s3, 256 }
 0x208   :  { %p335_p3 = scmp.ne.s32.totalorder %s509_s3, %s334_s29  ;;  %p338_p4 = scmp.lt.u32.totalorder %s334_s29, %s509_s3 }
 0x20a   :  { %p340_p5 = pnand %p338_p4, %p335_p3 }
 0x20c   :  { %343 = shalt.err (!%p340_p5)
}
 0x20d   :  { %160 = dma.vmem_to_hbm [thread:$0]  %s155_s0, 256, %s509_s3, [#allocation4], %s354_s1, %s354_s1, %s355_s15  }
 0x20e   :  { %348 = dma.done.wait [#allocation4], 256  }
 0x20f   :  { %349 = vsyncadd [#allocation4], 4294967040 }
 0x210   :  { %350 = dma.done.wait [#allocation10], 128  }
 0x211   :  { %351 = vsyncadd [#allocation10], 4294967168 }
 0x212   :  { %190 = vsyncpa [#allocation3], 1 }
 0x213   :  { %191 = vsyncpa [#allocation6], 1 }
 0x214   :  { %192 = vsyncpa [#allocation4], 1 }
 0x215   :  { %193 = vsyncpa [#allocation10], 1 }

</bundles_post_ra>
